<compile_context>
chip_gen: v5e
topology: v5e:2x2
jax: 0.10.0
libtpu: 0.0.40
codegen_flags: <defaults>
</compile_context>

<pallas_src>
import functools

import jax
import jax.numpy as jnp
from jax.experimental import pallas as pl
from jax.experimental.pallas import tpu as pltpu


def _pick_hw_tile(hw: int, max_tile: int = 512) -> int:
    """Largest multiple of 128 that divides hw (capped), else the full extent."""
    best = None
    t = 128
    while t <= min(hw, max_tile):
        if hw % t == 0:
            best = t
        t += 128
    return best if best is not None else hw


# ---------------------------------------------------------------------------
# Pass 1: tiled spatial reduction of x + fused gate (MLP + sigmoid)
# ---------------------------------------------------------------------------
def _reduce_gate_kernel(x_ref, avg_g_ref, wxT_ref, bx_ref, wgT_ref, bg_ref,
                        scale_ref, *, inv_hw: float):
    t = pl.program_id(0)

    @pl.when(t == 0)
    def _init():
        scale_ref[...] = jnp.zeros_like(scale_ref)

    # Accumulate per-channel spatial sums for this HW tile (output resident
    # across the reduce axis -> acts as the accumulator).
    scale_ref[...] += jnp.sum(x_ref[...], axis=-1)

    @pl.when(t == pl.num_programs(0) - 1)
    def _finalize():
        avg_x = scale_ref[...] * inv_hw                          # (B, Fx)
        # Weights arrive pre-transposed to (in, out): no in-kernel relayout.
        # (These dots are tiny and run once per call; they are padding-heavy
        # on the MXU but negligible next to the streaming passes.)
        att_x = jnp.dot(avg_x, wxT_ref[...],
                        preferred_element_type=jnp.float32) + bx_ref[...]
        att_g = jnp.dot(avg_g_ref[...], wgT_ref[...],
                        preferred_element_type=jnp.float32) + bg_ref[...]
        scale_ref[...] = jax.nn.sigmoid((att_x + att_g) * 0.5)


# ---------------------------------------------------------------------------
# Pass 2: lane-dense tiled  x * scale -> ReLU
# ---------------------------------------------------------------------------
def _scale_relu_kernel(x_ref, scale_ref, out_ref):
    # Per-tile body is load -> mul -> max -> store; the gate value was
    # computed once in pass 1 (no per-tile sigmoid / broadcast recompute).
    out_ref[...] = jnp.maximum(x_ref[...] * scale_ref[...], 0.0)


def cca_forward(g, x, wx, bx, wg, bg):
    """g: (B, F_g, Hg, Wg), x: (B, F_x, H, W)  ->  (B, F_x, H, W)."""
    B, Fx, H, W = x.shape
    _, Fg, Hg, Wg = g.shape
    hw = H * W
    thw = _pick_hw_tile(hw)
    n_tiles = hw // thw

    x_f = x.reshape(B, Fx, hw)

    # g is only consumed through its global spatial mean: pool it in XLA so
    # the full g tensor never has to be DMA'd into VMEM.
    avg_g = jnp.mean(g.reshape(B, Fg, Hg * Wg), axis=-1)          # (B, Fg)

    # Pre-transpose Linear weights to (in, out); reshape biases to rows.
    wxT = wx.T                                                    # (Fx, Fx)
    wgT = wg.T                                                    # (Fg, Fx)
    bx2 = bx.reshape(1, Fx)
    bg2 = bg.reshape(1, Fx)

    vmem_limit = 32 * 1024 * 1024   # fits v5e / v6e / v7x scoped-VMEM budgets

    # ---- pass 1: tiled reduce over HW + fused gate ----
    scale = pl.pallas_call(
        functools.partial(_reduce_gate_kernel, inv_hw=1.0 / hw),
        out_shape=jax.ShapeDtypeStruct((B, Fx), jnp.float32),
        grid=(n_tiles,),
        in_specs=[
            pl.BlockSpec((B, Fx, thw), lambda t: (0, 0, t)),
            pl.BlockSpec((B, Fg), lambda t: (0, 0)),
            pl.BlockSpec((Fx, Fx), lambda t: (0, 0)),
            pl.BlockSpec((1, Fx), lambda t: (0, 0)),
            pl.BlockSpec((Fg, Fx), lambda t: (0, 0)),
            pl.BlockSpec((1, Fx), lambda t: (0, 0)),
        ],
        out_specs=pl.BlockSpec((B, Fx), lambda t: (0, 0)),
        compiler_params=pltpu.CompilerParams(
            dimension_semantics=("arbitrary",),   # reduction axis (resident out)
            vmem_limit_bytes=vmem_limit,
        ),
    )(x_f, avg_g, wxT, bx2, wgT, bg2)

    # Shape the gate for cheap lane broadcast inside pass 2.
    scale3 = scale.reshape(B, Fx, 1)

    # ---- pass 2: lane-dense tiled elementwise scale + ReLU ----
    out = pl.pallas_call(
        _scale_relu_kernel,
        out_shape=jax.ShapeDtypeStruct((B, Fx, hw), x.dtype),
        grid=(n_tiles,),
        in_specs=[
            pl.BlockSpec((B, Fx, thw), lambda t: (0, 0, t)),
            pl.BlockSpec((B, Fx, 1), lambda t: (0, 0, 0)),
        ],
        out_specs=pl.BlockSpec((B, Fx, thw), lambda t: (0, 0, t)),
        compiler_params=pltpu.CompilerParams(
            dimension_semantics=("parallel",),    # shard HW tiles across TCs (v7x)
            vmem_limit_bytes=vmem_limit,
        ),
    )(x_f, scale3)

    return out.reshape(B, Fx, H, W)


def cca_reference(g, x, wx, bx, wg, bg):
    """Pure-JAX reference mirroring the PyTorch forward."""
    avg_x = jnp.mean(x, axis=(2, 3))                       # (B, Fx)
    avg_g = jnp.mean(g, axis=(2, 3))                       # (B, Fg)
    att_x = avg_x @ wx.T + bx
    att_g = avg_g @ wg.T + bg
    scale = jax.nn.sigmoid((att_x + att_g) / 2.0)[:, :, None, None]
    return jnp.maximum(x * scale, 0.0)


if __name__ == "__main__":
    # TODO(synk): the full UneXt50 (timm encoder, ASPP dilated convs,
    # PixelShuffle decoder, FPN, bilinear upsampling) is left to XLA; only the
    # channel-attention gate pattern is expressed as Pallas kernels here.
    B, F_x, F_g = 2, 4, 8
    H = W = 32            # HW = 1024 -> two 512-wide lane-dense tiles
    Hg = Wg = 32

    key = jax.random.PRNGKey(0)
    kx, kg, kwx, kbx, kwg, kbg = jax.random.split(key, 6)

    x = jax.random.normal(kx, (B, F_x, H, W), dtype=jnp.float32)
    g = jax.random.normal(kg, (B, F_g, Hg, Wg), dtype=jnp.float32)

    # Deterministic params (shapes match nn.Linear(F_x, F_x) / nn.Linear(F_g, F_x))
    wx = jax.random.normal(kwx, (F_x, F_x), dtype=jnp.float32) * 0.1
    bx = jax.random.normal(kbx, (F_x,), dtype=jnp.float32) * 0.1
    wg = jax.random.normal(kwg, (F_x, F_g), dtype=jnp.float32) * 0.1
    bg = jax.random.normal(kbg, (F_x,), dtype=jnp.float32) * 0.1

    out = cca_forward(g, x, wx, bx, wg, bg)
    out = jax.block_until_ready(out)

    ref = cca_reference(g, x, wx, bx, wg, bg)
    if not jnp.allclose(out, ref, atol=1e-5, rtol=1e-5):
        raise AssertionError("Pallas CCA kernel does not match reference")

    print("KERNEL_OK")
</pallas_src>

<mosaic_0001>
module attributes {stable_mosaic.version = 11 : i64} {
  func.func @_reduce_gate_kernel(%arg0: i32, %arg1: memref<2x4x512xf32, #tpu.memory_space<vmem>>, %arg2: memref<2x8xf32, #tpu.memory_space<vmem>>, %arg3: memref<4x4xf32, #tpu.memory_space<vmem>>, %arg4: memref<1x4xf32, #tpu.memory_space<vmem>>, %arg5: memref<8x4xf32, #tpu.memory_space<vmem>>, %arg6: memref<1x4xf32, #tpu.memory_space<vmem>>, %arg7: memref<2x4xf32, #tpu.memory_space<vmem>>) attributes {dimension_semantics = [#tpu.dimension_semantics<arbitrary>], iteration_bounds = array<i64: 2>, scalar_prefetch = 0 : i64, scratch_operands = 0 : i64, tpu.core_type = #tpu.core_type<tc>, window_params = [{transform_indices = @transform_0, window_bounds = array<i64: 2, 4, 512>}, {pipeline_mode = #tpu.pipeline_mode<synchronous>, transform_indices = @transform_1, window_bounds = array<i64: 2, 8>}, {pipeline_mode = #tpu.pipeline_mode<synchronous>, transform_indices = @transform_2, window_bounds = array<i64: 4, 4>}, {pipeline_mode = #tpu.pipeline_mode<synchronous>, transform_indices = @transform_3, window_bounds = array<i64: 1, 4>}, {pipeline_mode = #tpu.pipeline_mode<synchronous>, transform_indices = @transform_4, window_bounds = array<i64: 8, 4>}, {pipeline_mode = #tpu.pipeline_mode<synchronous>, transform_indices = @transform_5, window_bounds = array<i64: 1, 4>}, {pipeline_mode = #tpu.pipeline_mode<synchronous>, transform_indices = @transform_6, window_bounds = array<i64: 2, 4>}]} {
    %c0_i32 = arith.constant 0 : i32
    %0 = arith.cmpi eq, %arg0, %c0_i32 : i32
    %1 = arith.extui %0 : i1 to i32
    %c0_i32_0 = arith.constant 0 : i32
    %2 = arith.cmpi ne, %1, %c0_i32_0 : i32
    scf.if %2 {
      %cst_8 = arith.constant 0.000000e+00 : f32
      %11 = vector.broadcast %cst_8 : f32 to vector<2x4xf32>
      %c0_9 = arith.constant 0 : index
      %c0_10 = arith.constant 0 : index
      %12 = vector.load %arg7[%c0_9, %c0_10] : memref<2x4xf32, #tpu.memory_space<vmem>>, vector<2x4xf32>
      tpu.vector_store %arg7[%c0_9, %c0_10], %11 {strides = array<i32>} : memref<2x4xf32, #tpu.memory_space<vmem>>, vector<2x4xf32>,
    } else {
    }
    %c0 = arith.constant 0 : index
    %c0_1 = arith.constant 0 : index
    %3 = vector.load %arg7[%c0, %c0_1] : memref<2x4xf32, #tpu.memory_space<vmem>>, vector<2x4xf32>
    %c0_2 = arith.constant 0 : index
    %c0_3 = arith.constant 0 : index
    %c0_4 = arith.constant 0 : index
    %4 = vector.load %arg1[%c0_2, %c0_3, %c0_4] : memref<2x4x512xf32, #tpu.memory_space<vmem>>, vector<2x4x512xf32>
    %cst = arith.constant dense<0.000000e+00> : vector<2x4xf32>
    %5 = vector.multi_reduction <add>, %4, %cst [2] : vector<2x4x512xf32> to vector<2x4xf32>
    %6 = arith.addf %3, %5 : vector<2x4xf32>
    %c0_5 = arith.constant 0 : index
    %c0_6 = arith.constant 0 : index
    %7 = vector.load %arg7[%c0_5, %c0_6] : memref<2x4xf32, #tpu.memory_space<vmem>>, vector<2x4xf32>
    tpu.vector_store %arg7[%c0_5, %c0_6], %6 {strides = array<i32>} : memref<2x4xf32, #tpu.memory_space<vmem>>, vector<2x4xf32>,
    %c1_i32 = arith.constant 1 : i32
    %8 = arith.cmpi eq, %arg0, %c1_i32 : i32
    %9 = arith.extui %8 : i1 to i32
    %c0_i32_7 = arith.constant 0 : i32
    %10 = arith.cmpi ne, %9, %c0_i32_7 : i32
    scf.if %10 {
      %c0_8 = arith.constant 0 : index
      %c0_9 = arith.constant 0 : index
      %11 = vector.load %arg7[%c0_8, %c0_9] : memref<2x4xf32, #tpu.memory_space<vmem>>, vector<2x4xf32>
      %cst_10 = arith.constant 9.765625E-4 : f32
      %12 = vector.broadcast %cst_10 : f32 to vector<2x4xf32>
      %13 = arith.mulf %11, %12 : vector<2x4xf32>
      %c0_11 = arith.constant 0 : index
      %c0_12 = arith.constant 0 : index
      %14 = vector.load %arg3[%c0_11, %c0_12] : memref<4x4xf32, #tpu.memory_space<vmem>>, vector<4x4xf32>
      %cst_13 = arith.constant dense<0.000000e+00> : vector<2x4xf32>
      %15 = tpu.matmul %13, %14, %cst_13 {dimension_numbers = #tpu.dot_dimension_numbers<[1], [0], [0], [1], [0, 0, 1, 1], [], []>} : vector<2x4xf32>, vector<4x4xf32>, vector<2x4xf32> -> vector<2x4xf32>
      %c0_14 = arith.constant 0 : index
      %c0_15 = arith.constant 0 : index
      %16 = vector.load %arg4[%c0_14, %c0_15] : memref<1x4xf32, #tpu.memory_space<vmem>>, vector<1x4xf32>
      %17 = vector.broadcast %16 : vector<1x4xf32> to vector<2x4xf32>
      %18 = arith.addf %15, %17 : vector<2x4xf32>
      %c0_16 = arith.constant 0 : index
      %c0_17 = arith.constant 0 : index
      %19 = vector.load %arg2[%c0_16, %c0_17] : memref<2x8xf32, #tpu.memory_space<vmem>>, vector<2x8xf32>
      %c0_18 = arith.constant 0 : index
      %c0_19 = arith.constant 0 : index
      %20 = vector.load %arg5[%c0_18, %c0_19] : memref<8x4xf32, #tpu.memory_space<vmem>>, vector<8x4xf32>
      %cst_20 = arith.constant dense<0.000000e+00> : vector<2x4xf32>
      %21 = tpu.matmul %19, %20, %cst_20 {dimension_numbers = #tpu.dot_dimension_numbers<[1], [0], [0], [1], [0, 0, 1, 1], [], []>} : vector<2x8xf32>, vector<8x4xf32>, vector<2x4xf32> -> vector<2x4xf32>
      %c0_21 = arith.constant 0 : index
      %c0_22 = arith.constant 0 : index
      %22 = vector.load %arg6[%c0_21, %c0_22] : memref<1x4xf32, #tpu.memory_space<vmem>>, vector<1x4xf32>
      %23 = vector.broadcast %22 : vector<1x4xf32> to vector<2x4xf32>
      %24 = arith.addf %21, %23 : vector<2x4xf32>
      %25 = arith.addf %18, %24 : vector<2x4xf32>
      %cst_23 = arith.constant 5.000000e-01 : f32
      %26 = vector.broadcast %cst_23 : f32 to vector<2x4xf32>
      %27 = arith.mulf %25, %26 : vector<2x4xf32>
      %28 = arith.negf %27 : vector<2x4xf32>
      %29 = math.exp %28 : vector<2x4xf32>
      %cst_24 = arith.constant 1.000000e+00 : f32
      %30 = vector.broadcast %cst_24 : f32 to vector<2x4xf32>
      %31 = arith.addf %30, %29 : vector<2x4xf32>
      %32 = arith.divf %30, %31 : vector<2x4xf32>
      %c0_25 = arith.constant 0 : index
      %c0_26 = arith.constant 0 : index
      %33 = vector.load %arg7[%c0_25, %c0_26] : memref<2x4xf32, #tpu.memory_space<vmem>>, vector<2x4xf32>
      tpu.vector_store %arg7[%c0_25, %c0_26], %32 {strides = array<i32>} : memref<2x4xf32, #tpu.memory_space<vmem>>, vector<2x4xf32>,
    } else {
    }
    return
  }
  func.func @transform_0(%arg0: i32) -> (i32, i32, i32) {
    %c0_i32 = arith.constant 0 : i32
    %c0_i32_0 = arith.constant 0 : i32
    %c0_i32_1 = arith.constant 0 : i32
    return %c0_i32, %c0_i32_0, %arg0 : i32, i32, i32
  }
  func.func @transform_1(%arg0: i32) -> (i32, i32) {
    %c0_i32 = arith.constant 0 : i32
    %c0_i32_0 = arith.constant 0 : i32
    %c0_i32_1 = arith.constant 0 : i32
    return %c0_i32, %c0_i32_0 : i32, i32
  }
  func.func @transform_2(%arg0: i32) -> (i32, i32) {
    %c0_i32 = arith.constant 0 : i32
    %c0_i32_0 = arith.constant 0 : i32
    %c0_i32_1 = arith.constant 0 : i32
    return %c0_i32, %c0_i32_0 : i32, i32
  }
  func.func @transform_3(%arg0: i32) -> (i32, i32) {
    %c0_i32 = arith.constant 0 : i32
    %c0_i32_0 = arith.constant 0 : i32
    %c0_i32_1 = arith.constant 0 : i32
    return %c0_i32, %c0_i32_0 : i32, i32
  }
  func.func @transform_4(%arg0: i32) -> (i32, i32) {
    %c0_i32 = arith.constant 0 : i32
    %c0_i32_0 = arith.constant 0 : i32
    %c0_i32_1 = arith.constant 0 : i32
    return %c0_i32, %c0_i32_0 : i32, i32
  }
  func.func @transform_5(%arg0: i32) -> (i32, i32) {
    %c0_i32 = arith.constant 0 : i32
    %c0_i32_0 = arith.constant 0 : i32
    %c0_i32_1 = arith.constant 0 : i32
    return %c0_i32, %c0_i32_0 : i32, i32
  }
  func.func @transform_6(%arg0: i32) -> (i32, i32) {
    %c0_i32 = arith.constant 0 : i32
    %c0_i32_0 = arith.constant 0 : i32
    %c0_i32_1 = arith.constant 0 : i32
    return %c0_i32, %c0_i32_0 : i32, i32
  }
}

</mosaic_0001>

<bundles_post_ra>
// kernel: tpu_custom_call.1
= control target key start
LH: loop header
LB: loop body
LE: loop exit
PB: predicated region body
PF: predicated region fallthrough
CT: control target
= control target key end

     0   :  { %11 = vsyncpa [#allocation3], 0  ;;  %s809_s0 = inlined_call_operand.hbm [shape: f32[2,4,1024], index: 0, kind: input, shape index: {}]   ;;  %s810_s1 = inlined_call_operand.vmem [shape: f32[2,8], index: 1, kind: input, shape index: {}]   ;;  %s811_s2 = inlined_call_operand.vmem [shape: f32[4,4], index: 2, kind: input, shape index: {}]   ;;  %s812_s3 = inlined_call_operand.vmem [shape: f32[1,4], index: 3, kind: input, shape index: {}]   ;;  %s813_s4 = inlined_call_operand.vmem [shape: f32[8,4], index: 4, kind: input, shape index: {}]   ;;  %s814_s5 = inlined_call_operand.vmem [shape: f32[1,4], index: 5, kind: input, shape index: {}]   ;;  %s815_s6 = inlined_call_operand.hbm [shape: f32[2,4], index: 6, kind: output, shape index: {}]  }
   0x1   :  { %13 = vsyncpa [#allocation3 + $0x1], 0 }
   0x2   :  { %14 = vsyncpa [#allocation4], 0  ;;  %s692_s21 = smov 0   ;;  %s694_s22 = smov 0  }
   0x3   :  { %s696_s23 = smov 0   ;;  %s698_s24 = smov 0  }
   0x4 LB: > { %s711_s25 = sadd.s32 4294967295, %s650_s24   ;;  %s714_s26 = sadd.s32 1, %s650_s24   ;;  %s650_s24 = sphi %s698_s24, %s822_s24   ;;  %s646_s23 = sphi %s696_s23, %s821_s23   ;;  %s642_s22 = sphi %s694_s22, %s820_s22   ;;  %s638_s21 = sphi %s692_s21, %s819_s21  }
   0x5   : > { %s24_s27 = ssub.s32 %s650_s24, %s714_s26  ;;  %s27_s28 = sadd.s32 1, %s646_s23 }
   0x6   : > { %p25_p0 = scmp.eq.s32.totalorder %s24_s27, 0  ;;  %p34_p1 = scmp.ne.s32.totalorder %s646_s23, %s642_s22 }
   0x7   : > { %p35_p2 = scmp.eq.s32.totalorder %s650_s24, 0  ;;  %p40_p3 = scmp.ne.s32.totalorder %s642_s22, %s638_s21 }
   0x8   : > { %s724_s29 = scalar_select %p25_p0, %s646_s23, %s27_s28  }
   0x9   : > { %p726_p4 = por %p35_p2, %p34_p1  ;;  %p41_p5 = scmp.eq.s32.totalorder %s711_s25, 0 }
   0xa   : > { %p508_p6 = scmp.lt.s32.totalorder %s650_s24, 2  ;;  %s205_s8 = sand.u32 1, %s646_s23  }
   0xb   : > { %p732_p7 = por %p41_p5, %p40_p3  ;;  %s482_s9 = sshll.u32 %s205_s8, 5 }
   0xc   : > { %s497_s10 = sshll.u32 %s650_s24, 4  ;;  %s209_s14 = scalar_lea.vmem [#allocation2], %s482_s9 }
   0xd   : > { %s214_s13 = scalar_lea.hbm %s809_s0, %s497_s10  ;;  %s217_s15 = sshll.u32 %s209_s14, 4  ;;  %s218_s15 = int_to_ptr.vmem [resolvable:$true] %s217_s15 }
   0xe   : > { %s215_s16 = sshll.u32 %s214_s13, 4  ;;  %p743_p8 = pnand %p508_p6, %p726_p4  ;;  %s216_s16 = int_to_ptr.hbm [resolvable:$true] %s215_s16 }
   0xf   : > { %s206_s18 = scalar_lea.sflag [#allocation3], %s205_s8  ;;  %s554_s19 = sshra.s32 %s216_s16, 4  ;;  %s555_s19 = int_to_ptr.hbm [resolvable:$true] %s554_s19 }
  0x10   : > { %s556_s20 = scalar_lea.hbm %s555_s19, 32  ;;  %p558_p10 = pneg %p743_p8 }
  0x11   : > { %p557_p9 = scmp.ne.s32.totalorder %s555_s19, %s556_s20  ;;  %s561_s28 = scalar_lea.hbm %s809_s0, 64 }
  0x12   : > { %p562_p13 = scmp.lt.s32.totalorder %s555_s19, %s809_s0  ;;  %p563_p0 = scmp.lt.s32.totalorder %s561_s28, %s556_s20 }
  0x13   : > { %p559_p11 = pnand %p558_p10, %p557_p9 }
  0x14   : > { %p564_p1 = por %p563_p0, %p562_p13 }
  0x15   : > { %p560_p12 = pneg %p559_p11 }
  0x17   : > { %p565_p2 = pnand %p564_p1, %p560_p12 }
  0x19   : > { %568 = shalt.err (!%p565_p2)
}
  0x1a   : > { %s652_s8 = smov 512   ;;  %s653_s10 = smov 256  }
  0x1b   : > { %s654_s11 = smov 16   ;;  %p485_p3 = scmp.ge.s32.totalorder %s650_s24, 1 }
  0x1c   : > { %507 = dma.hbm_to_vmem [thread:$0]  (!%p743_p8), %s216_s16, 512, %s218_s15, %s206_s18, %s652_s8, %s653_s10, %s654_s11  }
  0x1d   : > { %p225_p4 = scmp.lt.s32.totalorder %s650_s24, 3 }
  0x1f   : > { %p226_p5 = pnand %p485_p3, %p225_p4 }
  0x20   : > { %s231_s12 = sand.u32 (!%p226_p5), 1, %s642_s22  }
  0x21   : > { %229 = sbr.rel (%p226_p5) target bundleno = 370 (0x172), region = 44  ;;  %s486_s13 = sshll.u32 (!%p226_p5), %s231_s12, 5 }
  0x22   : > { %s232_s14 = scalar_lea.sflag (!%p226_p5), [#allocation3], %s231_s12  ;;  %s235_s19 = scalar_lea.vmem (!%p226_p5), [#allocation2], %s486_s13 }
  0x26   : > { %629 = dma.done.wait (%p732_p7), %s232_s14, 512  }
  0x27   : > { %631 = vsyncadd (%p732_p7), %s232_s14, 4294966784  ;;  %p487_p6 = scmp.ne.s32.totalorder %s711_s25, 0 }
  0x29   : > { %264 = sbr.rel (%p487_p6) target bundleno = 48 (0x30), region = 52 }
  0x2e   : > { %vm265_vm0 = vcmask 25600   ;;  %v655_v0 = vmov 0.0  }
  0x2f   : > { %266 = vst.msk [vmem:[#allocation5] sm:$0x3] %vm265_vm0, %v655_v0 }
  0x30 PF: > { %v268_v1 = vld [vmem:[%s235_s19] sm:$0xff]  ;;  %v269_v2 = vld [vmem:[%s235_s19 + $0x8] sm:$0xff]  ;;  %v270_v3 = vld [vmem:[%s235_s19 + $0x10] sm:$0xff]  ;;  %vm299_vm1 = vcmask 1043456   ;;  %v320_v28 = vlaneseq  ;;  %vm324_vm2 = vcmask 1041409   ;;  %vm328_vm3 = vcmask 25600  }
  0x31   : > { %276 = vst [vmem:[#allocation1] ss:$2 sm:$0xff] %v268_v1  ;;  %v271_v4 = vld [vmem:[%s235_s19 + $0x18] sm:$0xff]  ;;  %p488_p7 = scmp.ne.s32.totalorder %s711_s25, 1 }
  0x32   : > { %278 = vst [vmem:[#allocation1 + $0x10] ss:$2 sm:$0xff] %v269_v2  ;;  %v321_v29 = vand.u32 127, %v320_v28 }
  0x33   : > { %284 = vst [vmem:[#allocation1 + $0x20] ss:$2 sm:$0xff] %v270_v3 }
  0x34   : > { %286 = vst [vmem:[#allocation1 + $0x30] ss:$2 sm:$0xff] %v271_v4 }
  0x36   : > { %v267_v32 = vld [vmem:[#allocation5] sm:$0x3] }
  0x38   : > { %v279_v5 = vld.sshfl [vmem:[#allocation1] sm:$0xff pattern:$0x75316420]  ;;  %v280_v6 = vld.sshfl [vmem:[#allocation1 + $0x8] sm:$0xff pattern:$0x75316420] }
  0x39   : > { %v281_v7 = vld.sshfl [vmem:[#allocation1 + $0x10] sm:$0xff pattern:$0x75316420]  ;;  %v282_v8 = vld.sshfl [vmem:[#allocation1 + $0x18] sm:$0xff pattern:$0x75316420] }
  0x3a   : > { %v300_v9 = vsel %vm299_vm1, %v279_v5, 0.0  ;;  %v301_v10 = vsel %vm299_vm1, %v280_v6, 0.0  ;;  %v303_v11 = vsel %vm299_vm1, %v281_v7, 0.0  ;;  %v287_v13 = vld.sshfl [vmem:[#allocation1 + $0x20] sm:$0xff pattern:$0x75316420] }
  0x3b   : > { %v302_v12 = vadd.f32 %v301_v10, %v300_v9  ;;  %v288_v14 = vld.sshfl [vmem:[#allocation1 + $0x28] sm:$0xff pattern:$0x75316420]  ;;  %v305_v15 = vsel %vm299_vm1, %v282_v8, 0.0  ;;  %v309_v18 = vsel %vm299_vm1, %v287_v13, 0.0 }
  0x3c   : > { %v289_v16 = vld.sshfl [vmem:[#allocation1 + $0x30] sm:$0xff pattern:$0x75316420]  ;;  %v310_v19 = vsel %vm299_vm1, %v288_v14, 0.0 }
  0x3d   : > { %v304_v17 = vadd.f32 %v303_v11, %v302_v12  ;;  %v311_v20 = vadd.f32 %v310_v19, %v309_v18  ;;  %v312_v21 = vsel %vm299_vm1, %v289_v16, 0.0  ;;  %v290_v23 = vld.sshfl [vmem:[#allocation1 + $0x38] sm:$0xff pattern:$0x75316420] }
  0x3e   : > { %v314_v25 = vsel %vm299_vm1, %v290_v23, 0.0 }
  0x3f   : > { %v306_v22 = vadd.f32 %v305_v15, %v304_v17  ;;  %v313_v24 = vadd.f32 %v312_v21, %v311_v20 }
  0x41   : > { %307 = vadd.xlane.f32.xlu0 %v306_v22  ;;  %v315_v26 = vadd.f32 %v314_v25, %v313_v24 }
  0x49   : > { %316 = vadd.xlane.f32.xlu0 %v315_v26 }
  0xb4   : > { %v308_v27 = vpop.xlane.xlu0 %307 }
  0xb5   : > { %v322_v31 = vperm.slane %v308_v27, %v321_v29 }
  0xbc   : > { %v317_v30 = vpop.xlane.xlu0 %316 }
  0xbd   : > { %v323_v33 = vperm.slane %v317_v30, %v321_v29 }
  0xbe   : > { %333 = sbr.rel (%p488_p7) target bundleno = 365 (0x16d), region = 56 }
  0xbf   : > { %v325_v34 = vsel %vm324_vm2, %v323_v33, %v322_v31 }
  0xc0   : > { %v327_v35 = vadd.f32 %v325_v34, %v267_v32 }
  0xc2   : > { %329 = vst.msk [vmem:[#allocation5] sm:$0x3] %vm328_vm3, %v327_v35 }
  0xc3   : > { %v336_v36 = vld [vmem:[%s811_s2] sm:$0xf]  ;;  %vm341_vm4 = vcmask 31744   ;;  %vm374_vm5 = vcmask 64512  }
  0xc4   : > { %v369_v37 = vld [vmem:[%s813_s4] sm:$0xff]  ;;  %489 = vmatpush.msk.msra.mxu0 %vm299_vm1, %v336_v36 }
  0xc5   : > { %393 = vmatpush.msra.mxu1 %v369_v37  ;;  %v368_v40 = vld [vmem:[%s810_s1] sm:$0x3] }
  0xc6   : > { %491 = vmatmul.msk.f32.vlgmr.msra.gmra.mxu1 %vm374_vm5, %v368_v40  ;;  %v549_v41 = vld [vmem:[%s814_s5] ss:$0 sm:$0xff] }
  0xc7   : > { %v548_v42 = vld [vmem:[%s812_s3] ss:$0 sm:$0xff] }
  0xc9   : > { %v334_v38 = vld [vmem:[#allocation5] sm:$0x3] }
  0xca   : > { %v335_v39 = vmul.f32 0.0009765625, %v334_v38 }
  0xcc   : > { %490 = vmatmul.msk.f32.vlgmr.msra.gmra.mxu0 %vm341_vm4, %v335_v39 }
 0x143   : > { %v395_v43 = vpop.f32.mrf.mxu1 }
 0x144   : > { %v396_v45 = vadd.f32 %v549_v41, %v395_v43 }
 0x149   : > { %v365_v44 = vpop.f32.mrf.mxu0 }
 0x14a   : > { %v366_v46 = vadd.f32 %v548_v42, %v365_v44 }
 0x14c   : > { %v398_v47 = vadd.f32 %v396_v45, %v366_v46 }
 0x14e   : > { %v492_v48 = vmul.f32 -0.5, %v398_v47 }
 0x150   : > { %v401_v49 = vmul.f32 1.442695, %v492_v48 }
 0x152   : > { %550 = vpow2.f32 %v401_v49 }
 0x158   : > { %v551_v50 = vpop.eup %550 }
 0x159   : > { %v403_v51 = vadd.f32 1.0, %v551_v50 }
 0x15b   : > { %552 = vrcp.f32 %v403_v51  ;;  %v415_v55 = vand.u32 2147483648, %v403_v51  ;;  %v413_v57 = vand.u32 2147483647, %v403_v51  ;;  %vm409_vm7 = vweird.f32 %v403_v51 }
 0x15d   : > { %v416_v59 = vor.u32 1.1754944e-38, %v415_v55  ;;  %vm414_vm9 = vcmp.eq.f32.partialorder %v413_v57, 8.507059e+37 }
 0x161   : > { %v553_v52 = vpop.eup %552 }
 0x162   : > { %v405_v53 = vmul.f32 %v553_v52, %v403_v51  ;;  %vm410_vm6 = vweird.f32 %v553_v52 }
 0x163   : > { %vm411_vm8 = vmor %vm409_vm7, %vm410_vm6 }
 0x164   : > { %v406_v54 = vsub.f32 1.0, %v405_v53 }
 0x166   : > { %v407_v56 = vmul.f32 %v553_v52, %v406_v54 }
 0x168   : > { %v408_v58 = vadd.f32 %v553_v52, %v407_v56 }
 0x16a   : > { %v412_v60 = vsel %vm411_vm8, %v553_v52, %v408_v58 }
 0x16b   : > { %v417_v61 = vsel %vm414_vm9, %v416_v59, %v412_v60 }
 0x16c   : > { %419 = vst.msk [vmem:[#allocation5] sm:$0x3] %vm328_vm3, %v417_v61 }
 0x16d PF: > { %p509_p8 = scmp.eq.s32.totalorder %s711_s25, 1  ;;  %s656_s9 = smov [#allocation5]  }
 0x16e   : > { %s426_s30 = sshll.u32 %s656_s9, 4  ;;  %s428_s11 = sshll.u32 %s815_s6, 4  ;;  %s427_s30 = int_to_ptr.vmem [resolvable:$true] %s426_s30  ;;  %s429_s11 = int_to_ptr.hbm [resolvable:$true] %s428_s11 }
 0x16f   : > { %501 = dma.vmem_to_hbm [thread:$0]  (%p509_p8), %s427_s30, 32, %s429_s11, [#allocation4]  }
 0x170   : > { %633 = dma.done.wait (%p509_p8), [#allocation4], 32  }
 0x171   : > { %635 = vsyncadd (%p509_p8), [#allocation4], 4294967264 }
 0x172 PF: > { %p17_p9 = scmp.ge.s32.totalorder %s714_s26, 4   ;;  %s819_s21 = smov %s642_s22 }
 0x173   : > { %s820_s22 = smov %s646_s23  ;;  %s821_s23 = smov %s724_s29 }
 0x174   : > { %s822_s24 = smov %s714_s26  ;;  %19 = sbr.rel (!%p17_p9) target bundleno = 4 (0x4), region = 92 }
 0x179   :  { %442 = vsyncpa [#allocation3], 1 }
 0x17a   :  { %444 = vsyncpa [#allocation3 + $0x1], 1 }
 0x17b   :  { %445 = vsyncpa [#allocation4], 1 }
 0x17c   :  { %447 = vsyncpa [#allocation4 + $0x1], 1 }

</bundles_post_ra>
